<compile_context>
chip_gen: v5e
topology: v5e:2x2
jax: 0.10.0
libtpu: 0.0.40
codegen_flags: <defaults>
</compile_context>

<pallas_src>
import jax
import jax.numpy as jnp
from jax.experimental import pallas as pl
from jax.experimental.pallas import tpu as pltpu

_MAX_TILE_ELEMS = 1 << 20            # ~1 Mi elements per tile (4 MiB for f32)
_VMEM_LIMIT_BYTES = 32 * 1024 * 1024


def _round_up(a, b):
    return (a + b - 1) // b * b


def _num_tensorcores():
    # v7x has 2 TensorCores per chip; v5e/v6e have 1.  Host-side, trace-time.
    try:
        kind = (getattr(jax.devices()[0], "device_kind", "") or "").lower()
        if "v7" in kind:
            return 2
    except Exception:
        pass
    return 1


def _choose_lane(total):
    # Prefer a lane width that divides the element count exactly (no padding
    # at all); otherwise fall back to 1024 lanes and pad only the tiny tail.
    for lane in (1024, 512, 256, 128):
        if total % lane == 0:
            return lane
    return min(1024, _round_up(total, 128))


def _exp_memb_kernel(params_ref, x_ref, o_ref):
    # params_ref (SMEM): [|l|, h]  -- |l| precomputed in the wrapper
    l_abs = params_ref[0]
    h = params_ref[1]
    x = x_ref[...].astype(jnp.float32)
    d = x - h
    # exp of a non-positive argument only -> never materializes inf in the
    # dead branch (even for x << h or garbage rows in the masked final block).
    u = l_abs * jnp.exp(-l_abs * jnp.maximum(d, 0.0))
    o_ref[...] = jnp.where(d >= 0.0, u, 0.0).astype(o_ref.dtype)


@jax.jit
def exponential_memb_func(x, l, h):
    """u(x) = |l| * exp(-|l| * (x - h)) if x >= h else 0, elementwise.

    Streams the data as a lane-dense (rows, lane) slab with ~4 MiB tiles so
    the kernel runs near the HBM roofline on v5e/v6e/v7x.
    """
    orig_shape = x.shape
    dtype = x.dtype
    if not jnp.issubdtype(dtype, jnp.floating):
        # Non-floating inputs are computed and returned in float32.
        x = x.astype(jnp.float32)
        dtype = jnp.float32

    total = int(x.size)
    if total == 0:
        return jnp.zeros(orig_shape, dtype)

    itemsize = jnp.dtype(dtype).itemsize
    # sublane granularity depends on dtype packing (f32: 8, bf16: 16, int8: 32)
    sub = 8 if itemsize >= 4 else (16 if itemsize == 2 else 32)

    lane = _choose_lane(total)
    rows = pl.cdiv(total, lane)
    padded_total = rows * lane

    # Tile sizing: big (~4 MiB) tiles for the streaming path.  Only split a
    # small input into >= 2 grid steps on dual-TC chips (v7x); on single-TC
    # chips the grid is a serial loop and the extra step is pure overhead.
    max_tile_rows = max(sub, _MAX_TILE_ELEMS // lane)
    if rows <= max_tile_rows:
        if _num_tensorcores() > 1 and rows >= 2 * sub:
            tile_rows = _round_up(pl.cdiv(rows, 2), sub)
        else:
            tile_rows = rows                      # single full-extent block
    else:
        tile_rows = max_tile_rows                 # multiple of `sub`
    grid = pl.cdiv(rows, tile_rows)               # ragged last block is masked

    xf = x.reshape(-1)
    if padded_total != total:
        # Only the sub-lane tail (< lane elements) is ever padded; blocks that
        # overrun `rows` are handled by Pallas boundary masking, not padding.
        xf = jnp.pad(xf, (0, padded_total - total))
    x2d = xf.reshape(rows, lane)

    # hoist |l| out of the kernel
    l_abs = jnp.abs(jnp.asarray(l, dtype=jnp.float32))
    h_f = jnp.asarray(h, dtype=jnp.float32)
    params = jnp.stack([l_abs, h_f])

    cost = pl.CostEstimate(
        flops=5 * total,
        transcendentals=total,
        bytes_accessed=2 * total * itemsize,
    )

    out2d = pl.pallas_call(
        _exp_memb_kernel,
        out_shape=jax.ShapeDtypeStruct((rows, lane), dtype),
        grid_spec=pltpu.PrefetchScalarGridSpec(
            num_scalar_prefetch=0,
            grid=(grid,),
            in_specs=[
                pl.BlockSpec(memory_space=pltpu.MemorySpace.SMEM),   # [|l|, h]
                pl.BlockSpec((tile_rows, lane), lambda i: (i, 0)),   # x tile
            ],
            out_specs=pl.BlockSpec((tile_rows, lane), lambda i: (i, 0)),
        ),
        compiler_params=pltpu.CompilerParams(
            dimension_semantics=("parallel",),
            # 2 bufs x (in + out) x 4 MiB tile = 16 MiB resident; 32 MiB is
            # safe on every generation (v7x physical VMEM is 64 MiB) and
            # above v5e's 16 MiB default scoped limit.
            vmem_limit_bytes=_VMEM_LIMIT_BYTES,
        ),
        cost_estimate=cost,
    )(params, x2d)

    out_flat = out2d.reshape(-1)
    if padded_total != total:
        out_flat = out_flat[:total]
    return out_flat.reshape(orig_shape)


if __name__ == "__main__":
    key = jax.random.PRNGKey(0)
    # NCHW input, small shape: batch=2, channels=4, spatial=16x16
    x = jax.random.normal(key, (2, 4, 16, 16), dtype=jnp.float32)

    # Deterministic scalar parameters (module __init__ takes scalars l, h)
    l_param = 1.5
    h_param = 0.0

    out = exponential_memb_func(x, l_param, h_param)
    out = jax.block_until_ready(out)

    # mirror the PyTorch assert: membership must be finite
    assert not bool(jnp.isinf(out).any()), "membership contains inf"

    # pure-JAX reference check
    l_abs = abs(l_param)
    ref = jnp.where(x >= h_param, l_abs * jnp.exp(-l_abs * (x - h_param)),
                    jnp.zeros_like(x))
    assert jnp.allclose(out, ref, atol=1e-6, rtol=1e-6), "mismatch vs reference"

    # also exercise a larger, non-lane-aligned shape (ragged-block + tail path)
    x_big = jax.random.normal(jax.random.PRNGKey(1), (3, 5, 33, 97), jnp.float32)
    out_big = jax.block_until_ready(exponential_memb_func(x_big, l_param, h_param))
    ref_big = jnp.where(x_big >= h_param,
                        l_abs * jnp.exp(-l_abs * (x_big - h_param)),
                        jnp.zeros_like(x_big))
    assert jnp.allclose(out_big, ref_big, atol=1e-6, rtol=1e-6), "big mismatch"

    print("KERNEL_OK")
</pallas_src>

<mosaic_0001>
module attributes {stable_mosaic.version = 11 : i64} {
  func.func @_exp_memb_kernel(%arg0: i32, %arg1: memref<2xf32, #tpu.memory_space<smem>>, %arg2: memref<2x1024xf32, #tpu.memory_space<vmem>>, %arg3: memref<2x1024xf32, #tpu.memory_space<vmem>>) attributes {dimension_semantics = [#tpu.dimension_semantics<parallel>], iteration_bounds = array<i64: 1>, scalar_prefetch = 0 : i64, scratch_operands = 0 : i64, tpu.core_type = #tpu.core_type<tc>, window_params = [{transform_indices = @transform_0, window_bounds = array<i64: 2>}, {transform_indices = @transform_1, window_bounds = array<i64: 2, 1024>}, {transform_indices = @transform_2, window_bounds = array<i64: 2, 1024>}]} {
    %c0 = arith.constant 0 : index
    %0 = memref.load %arg1[%c0] : memref<2xf32, #tpu.memory_space<smem>>
    %c1 = arith.constant 1 : index
    %1 = memref.load %arg1[%c1] : memref<2xf32, #tpu.memory_space<smem>>
    %c0_0 = arith.constant 0 : index
    %c0_1 = arith.constant 0 : index
    %2 = vector.load %arg2[%c0_0, %c0_1] : memref<2x1024xf32, #tpu.memory_space<vmem>>, vector<2x1024xf32>
    %3 = vector.broadcast %1 : f32 to vector<2x1024xf32>
    %4 = arith.subf %2, %3 : vector<2x1024xf32>
    %cst = arith.constant 0.000000e+00 : f32
    %5 = arith.subf %cst, %0 : f32
    %cst_2 = arith.constant 0.000000e+00 : f32
    %6 = vector.broadcast %cst_2 : f32 to vector<2x1024xf32>
    %7 = arith.maximumf %4, %6 : vector<2x1024xf32>
    %8 = vector.broadcast %5 : f32 to vector<2x1024xf32>
    %9 = arith.mulf %8, %7 : vector<2x1024xf32>
    %10 = math.exp %9 : vector<2x1024xf32>
    %11 = vector.broadcast %0 : f32 to vector<2x1024xf32>
    %12 = arith.mulf %11, %10 : vector<2x1024xf32>
    %cst_3 = arith.constant 0.000000e+00 : f32
    %13 = vector.broadcast %cst_3 : f32 to vector<2x1024xf32>
    %14 = arith.cmpf oge, %4, %13 : vector<2x1024xf32>
    %cst_4 = arith.constant 0.000000e+00 : f32
    %15 = vector.broadcast %cst_4 : f32 to vector<2x1024xf32>
    %16 = arith.select %14, %12, %15 : vector<2x1024xi1>, vector<2x1024xf32>
    %c0_5 = arith.constant 0 : index
    %c0_6 = arith.constant 0 : index
    %17 = vector.load %arg3[%c0_5, %c0_6] : memref<2x1024xf32, #tpu.memory_space<vmem>>, vector<2x1024xf32>
    tpu.vector_store %arg3[%c0_5, %c0_6], %16 {strides = array<i32>} : memref<2x1024xf32, #tpu.memory_space<vmem>>, vector<2x1024xf32>,
    return
  }
  func.func @transform_0(%arg0: i32) -> i32 {
    %c0_i32 = arith.constant 0 : i32
    %c0_i32_0 = arith.constant 0 : i32
    return %c0_i32 : i32
  }
  func.func @transform_1(%arg0: i32) -> (i32, i32) {
    %c0_i32 = arith.constant 0 : i32
    %c0_i32_0 = arith.constant 0 : i32
    return %arg0, %c0_i32 : i32, i32
  }
  func.func @transform_2(%arg0: i32) -> (i32, i32) {
    %c0_i32 = arith.constant 0 : i32
    %c0_i32_0 = arith.constant 0 : i32
    return %arg0, %c0_i32 : i32, i32
  }
}

</mosaic_0001>

<bundles_post_ra>
// kernel: exponential_memb_func.1
= control target key start
LH: loop header
LB: loop body
LE: loop exit
PB: predicated region body
PF: predicated region fallthrough
CT: control target
= control target key end

     0   :  { %7 = vsyncpa [#allocation3], 0  ;;  %s75_s12 = smov [#allocation2]   ;;  %s106_s0 = inlined_call_operand.vmem [shape: f32[2], index: 0, kind: input, shape index: {}]   ;;  %s107_s1 = inlined_call_operand.vmem [shape: f32[2,1024], index: 1, kind: input, shape index: {}]   ;;  %s108_s2 = inlined_call_operand.vmem [shape: f32[2,1024], index: 2, kind: output, shape index: {}]  }
   0x1   :  { %s13_s11 = sshll.u32 %s106_s0, 4  ;;  %s14_s11 = int_to_ptr.vmem [resolvable:$true] %s13_s11 }
   0x2   :  { %16 = dma.vmem_to_smem %s14_s11, 16, %s75_s12, [#allocation3]  }
   0x3   :  { %73 = dma.done.wait [#allocation3], 16  }
   0x4   :  { %74 = vsyncadd [#allocation3], 4294967280 }
   0x5   :  { %23 = sfence }
   0x6   :  { %s24_s13 = sld [smem:[#allocation2]]  ;;  %v26_v0 = vld [vmem:[%s107_s1] sm:$0xff]  ;;  %v27_v1 = vld [vmem:[%s107_s1 + $0x8] sm:$0xff] }
   0x7   :  { %s55_s14 = sld [smem:[#allocation2 + $0x1]] }
   0xc   :  { %s31_s19 = ssub.f32 0.0, %s24_s13  ;;  %v41_v12 = vstv %s24_s13 }
   0xd   :  { %v28_v2 = vstv %s55_s14 }
   0xe   :  { %v29_v3 = vsub.f32 %v26_v0, %v28_v2  ;;  %v30_v4 = vsub.f32 %v27_v1, %v28_v2  ;;  %v34_v5 = vstv %s31_s19 }
  0x10   :  { %v32_v6 = vmax.f32 %v29_v3, 0.0  ;;  %v33_v7 = vmax.f32 %v30_v4, 0.0  ;;  %vm44_vm0 = vcmp.ge.f32.partialorder %v29_v3, 0.0  ;;  %vm45_vm1 = vcmp.ge.f32.partialorder %v30_v4, 0.0 }
  0x12   :  { %v35_v8 = vmul.f32 %v34_v5, %v32_v6  ;;  %v36_v9 = vmul.f32 %v34_v5, %v33_v7 }
  0x14   :  { %v37_v10 = vmul.f32 1.442695, %v35_v8  ;;  %v39_v11 = vmul.f32 1.442695, %v36_v9 }
  0x16   :  { %57 = vpow2.f32 %v37_v10 }
  0x17   :  { %59 = vpow2.f32 %v39_v11 }
  0x1c   :  { %v58_v13 = vpop.eup %57 }
  0x1d   :  { %v60_v14 = vpop.eup %59  ;;  %v42_v15 = vmul.f32 %v58_v13, %v41_v12 }
  0x1e   :  { %v43_v16 = vmul.f32 %v60_v14, %v41_v12 }
  0x1f   :  { %v46_v17 = vsel %vm44_vm0, %v42_v15, 0.0 }
  0x20   :  { %48 = vst [vmem:[%s108_s2] sm:$0xff] %v46_v17  ;;  %v47_v18 = vsel %vm45_vm1, %v43_v16, 0.0 }
  0x21   :  { %49 = vst [vmem:[%s108_s2 + $0x8] sm:$0xff] %v47_v18 }
  0x22   :  { %54 = vsyncpa [#allocation3], 1 }

</bundles_post_ra>
